<compile_context>
chip_gen: v7x
topology: tpu7x:2x2x1
jax: 0.10.0
libtpu: 0.0.40
codegen_flags: <defaults>
</compile_context>

<pallas_src>
import functools

import jax
import jax.numpy as jnp
import numpy as np
from jax.experimental import pallas as pl
from jax.experimental.pallas import tpu as pltpu

_LANE = 128      # vreg lane width: hidden/output feature dims padded to this
_SUBLANE = 8     # f32 sublane count: batch tile padded to a multiple of this
_MAX_VMEM = 64 * 1024 * 1024   # valid on v5e/v6e (128 MiB phys) and v7x (64 MiB)
_MIN_VMEM = 16 * 1024 * 1024


def _round_up(n, m):
    return ((n + m - 1) // m) * m


def _fused_mlp_kernel(*refs, n_hidden, capture, use_bf16):
    """Whole MLP for one batch tile.

    refs = [x, W0, b0, ..., W_out, b_out,  out (, h_0, ..., h_{n_hidden-1})]
    """
    n_layers = n_hidden + 1
    x_ref = refs[0]
    wb_refs = refs[1:1 + 2 * n_layers]
    out_refs = refs[1 + 2 * n_layers:]
    o_ref = out_refs[0]
    h_refs = out_refs[1:]

    cur = x_ref[...]  # f32 activations
    for i in range(n_layers):
        w = wb_refs[2 * i][...]
        b = wb_refs[2 * i + 1][...]
        lhs = cur.astype(jnp.bfloat16) if use_bf16 else cur  # weights pre-cast host-side
        y = jnp.dot(lhs, w, preferred_element_type=jnp.float32) + b  # MXU, f32 accumulate
        if i < n_hidden:
            cur = jnp.maximum(y, 0.0)      # ReLU on the VPU, stays f32
            if capture:
                h_refs[i][...] = cur       # lane-dense full-vreg store
        else:
            # Exact sigmoid (PyTorch parity); exp lives on the EUP slot.
            o_ref[...] = 1.0 / (1.0 + jnp.exp(-y))


def _init_linear(key, in_dim, out_dim):
    """PyTorch nn.Linear init: U(-1/sqrt(in_dim), 1/sqrt(in_dim)) for W and b.

    W is returned already transposed to [in_dim, out_dim]; b is [1, out_dim]."""
    kw, kb = jax.random.split(key)
    bound = 1.0 / float(np.sqrt(in_dim))
    w = jax.random.uniform(kw, (in_dim, out_dim), jnp.float32, -bound, bound)
    b = jax.random.uniform(kb, (1, out_dim), jnp.float32, -bound, bound)
    return w, b


def _pad2d(a, rows, cols):
    return jnp.pad(a, ((0, rows - a.shape[0]), (0, cols - a.shape[1])))


def _choose_tile_m(batch):
    """Batch tile: 256 rows matches the v6e/v7x MXU (and is fine on v5e's 4x128);
    small batches collapse to a single sublane-aligned tile."""
    if batch >= 256:
        tile = 256
    elif batch >= 128:
        tile = 128
    else:
        tile = _round_up(batch, _SUBLANE)
    return tile, _round_up(batch, tile)


class SimpleNNPallas:
    """JAX/Pallas port of the PyTorch SimpleNN forward pass (single fused kernel)."""

    def __init__(self, input_dim, hidden_dims, output_dim, key, use_bf16_matmul=False):
        self.input_dim = int(input_dim)
        self.hidden_dims = [int(d) for d in hidden_dims]
        self.output_dim = int(output_dim)
        self.use_bf16_matmul = bool(use_bf16_matmul)

        dims = [self.input_dim] + self.hidden_dims + [self.output_dim]
        keys = jax.random.split(key, len(dims) - 1)
        # Logical (unpadded) f32 parameters — also used for the pure-JAX reference.
        self.params = [_init_linear(keys[i], dims[i], dims[i + 1]) for i in range(len(dims) - 1)]

        # Padded, kernel-ready copies.  Layer-0 K (input_dim) is left UNPADDED so
        # the host never materializes a feature-padded copy of x; all other
        # feature dims are padded to 128 lanes (lane-dense matmuls + stores).
        self.padded_out_dims = [_round_up(d, _LANE) for d in dims[1:]]
        w_dtype = jnp.bfloat16 if self.use_bf16_matmul else jnp.float32
        self.padded_params = []
        for i, (w, b) in enumerate(self.params):
            in_p = self.input_dim if i == 0 else self.padded_out_dims[i - 1]
            out_p = self.padded_out_dims[i]
            wp = _pad2d(w, in_p, out_p).astype(w_dtype)   # weights pre-cast ONCE
            bp = _pad2d(b, 1, out_p)                      # bias stays f32
            self.padded_params.append((wp, bp))

        # Mirrors the PyTorch module's activation stash (filled only on request,
        # with a single host sync — not one per layer).
        self.activations = {}
        self._forward_cache = {}

    # ---- fused forward builder -------------------------------------------------
    def _build_forward(self, batch, capture):
        n_hidden = len(self.hidden_dims)
        pouts = self.padded_out_dims
        input_dim, output_dim = self.input_dim, self.output_dim
        hidden_dims = self.hidden_dims

        tile_m, bp = _choose_tile_m(batch)
        grid = (bp // tile_m,)
        flat_params = [a for wb in self.padded_params for a in wb]

        kernel = functools.partial(
            _fused_mlp_kernel, n_hidden=n_hidden, capture=capture,
            use_bf16=self.use_bf16_matmul)

        # --- specs ----------------------------------------------------------
        # x / out / hiddens move per grid step; weights & biases stay resident.
        x_spec = pl.BlockSpec((tile_m, input_dim), lambda i: (i, 0))
        wb_specs = []
        for wp, bpar in self.padded_params:
            wb_specs.append(pl.BlockSpec(wp.shape, lambda i: (0, 0)))
            wb_specs.append(pl.BlockSpec(bpar.shape, lambda i: (0, 0)))
        in_specs = [x_spec] + wb_specs

        out_shapes = [jax.ShapeDtypeStruct((bp, pouts[-1]), jnp.float32)]
        out_specs = [pl.BlockSpec((tile_m, pouts[-1]), lambda i: (i, 0))]
        if capture:
            for h in range(n_hidden):
                out_shapes.append(jax.ShapeDtypeStruct((bp, pouts[h]), jnp.float32))
                out_specs.append(pl.BlockSpec((tile_m, pouts[h]), lambda i: (i, 0)))

        # --- VMEM budget ------------------------------------------------------
        param_bytes = sum(int(a.nbytes) for a in flat_params)
        io_tile_bytes = tile_m * (input_dim + sum(s.shape[1] for s in out_shapes)) * 4
        work_bytes = 3 * tile_m * max(pouts) * 4          # in-flight activation values
        footprint = param_bytes + 2 * io_tile_bytes + work_bytes   # x2: double buffering
        vmem_limit = int(min(max(2 * footprint, _MIN_VMEM), _MAX_VMEM))
        # TODO(synk): if param_bytes alone exceeds the VMEM budget, keep weights in
        # HBM (memory_space=pl.ANY) and stream them per layer with emit_pipeline.

        # --- cost estimate ------------------------------------------------------
        dims_in = [input_dim] + pouts[:-1]
        flops = 2 * sum(bp * k * n for k, n in zip(dims_in, pouts))
        bytes_accessed = (param_bytes + bp * input_dim * 4
                          + sum(int(np.prod(s.shape)) * 4 for s in out_shapes))
        cost = pl.CostEstimate(flops=flops, transcendentals=bp * pouts[-1],
                               bytes_accessed=bytes_accessed)

        call = pl.pallas_call(
            kernel,
            out_shape=tuple(out_shapes),
            grid=grid,
            in_specs=in_specs,
            out_specs=tuple(out_specs),
            compiler_params=pltpu.CompilerParams(
                dimension_semantics=("parallel",),
                vmem_limit_bytes=vmem_limit),
            cost_estimate=cost,
        )

        def fwd(x):
            # Only the batch is padded (single pad op, skipped when already aligned).
            xp = x if bp == batch else jnp.pad(x, ((0, bp - batch), (0, 0)))
            results = call(xp, *flat_params)
            out = results[0][:batch, :output_dim]
            hiddens = tuple(results[1 + i][:batch, :hidden_dims[i]]
                            for i in range(n_hidden)) if capture else ()
            return out, hiddens

        return jax.jit(fwd)

    # ---- public forward ----------------------------------------------------------
    def forward(self, x, capture_activations=False):
        batch = int(x.shape[0])
        cache_key = (batch, bool(capture_activations))
        if cache_key not in self._forward_cache:
            self._forward_cache[cache_key] = self._build_forward(batch, capture_activations)
        out, hiddens = self._forward_cache[cache_key](x)
        if capture_activations:
            # One host sync for the whole stash (vs. one per layer in PyTorch).
            self.activations["input"] = np.asarray(jax.device_get(x))
            for i, h in enumerate(jax.device_get(hiddens)):
                self.activations[f"hidden_{i}"] = np.asarray(h)
        return out


def _reference_forward(params, x):
    """Pure-JAX reference matching the PyTorch module (f32)."""
    cur = x
    for w, b in params[:-1]:
        cur = jnp.maximum(cur @ w + b, 0.0)
    w, b = params[-1]
    return jax.nn.sigmoid(cur @ w + b)


if __name__ == "__main__":
    key = jax.random.PRNGKey(0)
    k_params, k_x = jax.random.split(key)

    batch = 8
    input_dim = 32
    hidden_dims = [64, 32]
    output_dim = 8

    model = SimpleNNPallas(input_dim, hidden_dims, output_dim, k_params)
    x = jax.random.normal(k_x, (batch, input_dim), dtype=jnp.float32)

    # Fast path: single fused, gridded kernel; no host syncs for activations.
    out = jax.block_until_ready(model.forward(x))
    assert out.shape == (batch, output_dim)

    ref = _reference_forward(model.params, x)
    np.testing.assert_allclose(np.asarray(out), np.asarray(ref), rtol=2e-4, atol=2e-4)

    # Opt-in activation capture (still one kernel launch, one host sync).
    out2 = jax.block_until_ready(model.forward(x, capture_activations=True))
    np.testing.assert_allclose(np.asarray(out2), np.asarray(ref), rtol=2e-4, atol=2e-4)
    assert set(model.activations) == {"input", "hidden_0", "hidden_1"}
    assert model.activations["hidden_0"].shape == (batch, hidden_dims[0])
    assert model.activations["hidden_1"].shape == (batch, hidden_dims[1])

    # Sigmoid output must lie in (0, 1).
    assert bool(jnp.all(out > 0.0)) and bool(jnp.all(out < 1.0))

    # Optional bf16-weight path (v6e/v7x throughput mode): f32 accumulate,
    # weights pre-cast on host, looser tolerance expected.
    model_bf16 = SimpleNNPallas(input_dim, hidden_dims, output_dim, k_params,
                                use_bf16_matmul=True)
    out_bf16 = jax.block_until_ready(model_bf16.forward(x))
    np.testing.assert_allclose(np.asarray(out_bf16), np.asarray(ref), rtol=5e-2, atol=5e-2)

    print("KERNEL_OK")
</pallas_src>

<mosaic_0001>
module attributes {stable_mosaic.version = 11 : i64} {
  func.func @_fused_mlp_kernel(%arg0: i32, %arg1: memref<8x32xf32, #tpu.memory_space<vmem>>, %arg2: memref<32x128xf32, #tpu.memory_space<vmem>>, %arg3: memref<1x128xf32, #tpu.memory_space<vmem>>, %arg4: memref<128x128xf32, #tpu.memory_space<vmem>>, %arg5: memref<1x128xf32, #tpu.memory_space<vmem>>, %arg6: memref<128x128xf32, #tpu.memory_space<vmem>>, %arg7: memref<1x128xf32, #tpu.memory_space<vmem>>, %arg8: memref<8x128xf32, #tpu.memory_space<vmem>>) attributes {dimension_semantics = [#tpu.dimension_semantics<parallel>], iteration_bounds = array<i64: 1>, scalar_prefetch = 0 : i64, scratch_operands = 0 : i64, tpu.core_type = #tpu.core_type<tc>, window_params = [{transform_indices = @transform_0, window_bounds = array<i64: 8, 32>}, {pipeline_mode = #tpu.pipeline_mode<synchronous>, transform_indices = @transform_1, window_bounds = array<i64: 32, 128>}, {pipeline_mode = #tpu.pipeline_mode<synchronous>, transform_indices = @transform_2, window_bounds = array<i64: 1, 128>}, {pipeline_mode = #tpu.pipeline_mode<synchronous>, transform_indices = @transform_3, window_bounds = array<i64: 128, 128>}, {pipeline_mode = #tpu.pipeline_mode<synchronous>, transform_indices = @transform_4, window_bounds = array<i64: 1, 128>}, {pipeline_mode = #tpu.pipeline_mode<synchronous>, transform_indices = @transform_5, window_bounds = array<i64: 128, 128>}, {pipeline_mode = #tpu.pipeline_mode<synchronous>, transform_indices = @transform_6, window_bounds = array<i64: 1, 128>}, {transform_indices = @transform_7, window_bounds = array<i64: 8, 128>}]} {
    %c0 = arith.constant 0 : index
    %c0_0 = arith.constant 0 : index
    %0 = vector.load %arg1[%c0, %c0_0] : memref<8x32xf32, #tpu.memory_space<vmem>>, vector<8x32xf32>
    %c0_1 = arith.constant 0 : index
    %c0_2 = arith.constant 0 : index
    %1 = vector.load %arg2[%c0_1, %c0_2] : memref<32x128xf32, #tpu.memory_space<vmem>>, vector<32x128xf32>
    %c0_3 = arith.constant 0 : index
    %c0_4 = arith.constant 0 : index
    %2 = vector.load %arg3[%c0_3, %c0_4] : memref<1x128xf32, #tpu.memory_space<vmem>>, vector<1x128xf32>
    %cst = arith.constant dense<0.000000e+00> : vector<8x128xf32>
    %3 = tpu.matmul %0, %1, %cst {dimension_numbers = #tpu.dot_dimension_numbers<[1], [0], [0], [1], [0, 0, 1, 1], [], []>} : vector<8x32xf32>, vector<32x128xf32>, vector<8x128xf32> -> vector<8x128xf32>
    %4 = vector.broadcast %2 : vector<1x128xf32> to vector<8x128xf32>
    %5 = arith.addf %3, %4 : vector<8x128xf32>
    %cst_5 = arith.constant 0.000000e+00 : f32
    %6 = vector.broadcast %cst_5 : f32 to vector<8x128xf32>
    %7 = arith.maximumf %5, %6 : vector<8x128xf32>
    %c0_6 = arith.constant 0 : index
    %c0_7 = arith.constant 0 : index
    %8 = vector.load %arg4[%c0_6, %c0_7] : memref<128x128xf32, #tpu.memory_space<vmem>>, vector<128x128xf32>
    %c0_8 = arith.constant 0 : index
    %c0_9 = arith.constant 0 : index
    %9 = vector.load %arg5[%c0_8, %c0_9] : memref<1x128xf32, #tpu.memory_space<vmem>>, vector<1x128xf32>
    %cst_10 = arith.constant dense<0.000000e+00> : vector<8x128xf32>
    %10 = tpu.matmul %7, %8, %cst_10 {dimension_numbers = #tpu.dot_dimension_numbers<[1], [0], [0], [1], [0, 0, 1, 1], [], []>} : vector<8x128xf32>, vector<128x128xf32>, vector<8x128xf32> -> vector<8x128xf32>
    %11 = vector.broadcast %9 : vector<1x128xf32> to vector<8x128xf32>
    %12 = arith.addf %10, %11 : vector<8x128xf32>
    %cst_11 = arith.constant 0.000000e+00 : f32
    %13 = vector.broadcast %cst_11 : f32 to vector<8x128xf32>
    %14 = arith.maximumf %12, %13 : vector<8x128xf32>
    %c0_12 = arith.constant 0 : index
    %c0_13 = arith.constant 0 : index
    %15 = vector.load %arg6[%c0_12, %c0_13] : memref<128x128xf32, #tpu.memory_space<vmem>>, vector<128x128xf32>
    %c0_14 = arith.constant 0 : index
    %c0_15 = arith.constant 0 : index
    %16 = vector.load %arg7[%c0_14, %c0_15] : memref<1x128xf32, #tpu.memory_space<vmem>>, vector<1x128xf32>
    %cst_16 = arith.constant dense<0.000000e+00> : vector<8x128xf32>
    %17 = tpu.matmul %14, %15, %cst_16 {dimension_numbers = #tpu.dot_dimension_numbers<[1], [0], [0], [1], [0, 0, 1, 1], [], []>} : vector<8x128xf32>, vector<128x128xf32>, vector<8x128xf32> -> vector<8x128xf32>
    %18 = vector.broadcast %16 : vector<1x128xf32> to vector<8x128xf32>
    %19 = arith.addf %17, %18 : vector<8x128xf32>
    %cst_17 = arith.constant 0.000000e+00 : f32
    %20 = vector.broadcast %cst_17 : f32 to vector<8x128xf32>
    %21 = arith.subf %20, %19 : vector<8x128xf32>
    %22 = math.exp %21 : vector<8x128xf32>
    %cst_18 = arith.constant 1.000000e+00 : f32
    %23 = vector.broadcast %cst_18 : f32 to vector<8x128xf32>
    %24 = arith.addf %23, %22 : vector<8x128xf32>
    %cst_19 = arith.constant 1.000000e+00 : f32
    %25 = vector.broadcast %cst_19 : f32 to vector<8x128xf32>
    %26 = arith.divf %25, %24 : vector<8x128xf32>
    %c0_20 = arith.constant 0 : index
    %c0_21 = arith.constant 0 : index
    %27 = vector.load %arg8[%c0_20, %c0_21] : memref<8x128xf32, #tpu.memory_space<vmem>>, vector<8x128xf32>
    tpu.vector_store %arg8[%c0_20, %c0_21], %26 {strides = array<i32>} : memref<8x128xf32, #tpu.memory_space<vmem>>, vector<8x128xf32>,
    return
  }
  func.func @transform_0(%arg0: i32) -> (i32, i32) {
    %c0_i32 = arith.constant 0 : i32
    %c0_i32_0 = arith.constant 0 : i32
    return %arg0, %c0_i32 : i32, i32
  }
  func.func @transform_1(%arg0: i32) -> (i32, i32) {
    %c0_i32 = arith.constant 0 : i32
    %c0_i32_0 = arith.constant 0 : i32
    %c0_i32_1 = arith.constant 0 : i32
    return %c0_i32, %c0_i32_0 : i32, i32
  }
  func.func @transform_2(%arg0: i32) -> (i32, i32) {
    %c0_i32 = arith.constant 0 : i32
    %c0_i32_0 = arith.constant 0 : i32
    %c0_i32_1 = arith.constant 0 : i32
    return %c0_i32, %c0_i32_0 : i32, i32
  }
  func.func @transform_3(%arg0: i32) -> (i32, i32) {
    %c0_i32 = arith.constant 0 : i32
    %c0_i32_0 = arith.constant 0 : i32
    %c0_i32_1 = arith.constant 0 : i32
    return %c0_i32, %c0_i32_0 : i32, i32
  }
  func.func @transform_4(%arg0: i32) -> (i32, i32) {
    %c0_i32 = arith.constant 0 : i32
    %c0_i32_0 = arith.constant 0 : i32
    %c0_i32_1 = arith.constant 0 : i32
    return %c0_i32, %c0_i32_0 : i32, i32
  }
  func.func @transform_5(%arg0: i32) -> (i32, i32) {
    %c0_i32 = arith.constant 0 : i32
    %c0_i32_0 = arith.constant 0 : i32
    %c0_i32_1 = arith.constant 0 : i32
    return %c0_i32, %c0_i32_0 : i32, i32
  }
  func.func @transform_6(%arg0: i32) -> (i32, i32) {
    %c0_i32 = arith.constant 0 : i32
    %c0_i32_0 = arith.constant 0 : i32
    %c0_i32_1 = arith.constant 0 : i32
    return %c0_i32, %c0_i32_0 : i32, i32
  }
  func.func @transform_7(%arg0: i32) -> (i32, i32) {
    %c0_i32 = arith.constant 0 : i32
    %c0_i32_0 = arith.constant 0 : i32
    return %arg0, %c0_i32 : i32, i32
  }
}

</mosaic_0001>

<bundles_post_ra>
// kernel: fwd.1
= control target key start
LH: loop header
LB: loop body
LE: loop exit
PB: predicated region body
PF: predicated region fallthrough
CT: control target
= control target key end

     0   :  { %12 = vsyncpa [#allocation3], 0  ;;  %s837_s0 = inlined_call_operand.hbm [shape: f32[8,32], index: 0, kind: input, shape index: {}]   ;;  %s838_s1 = inlined_call_operand.hbm [shape: f32[32,128], index: 1, kind: input, shape index: {}]   ;;  %s839_s2 = inlined_call_operand.vmem [shape: f32[1,128], index: 2, kind: input, shape index: {}]   ;;  %s840_s3 = inlined_call_operand.hbm [shape: f32[128,128], index: 3, kind: input, shape index: {}]   ;;  %s841_s4 = inlined_call_operand.vmem [shape: f32[1,128], index: 4, kind: input, shape index: {}]   ;;  %s842_s5 = inlined_call_operand.hbm [shape: f32[128,128], index: 5, kind: input, shape index: {}]   ;;  %s843_s6 = inlined_call_operand.vmem [shape: f32[1,128], index: 6, kind: input, shape index: {}]   ;;  %s844_s7 = inlined_call_operand.hbm [shape: f32[8,128], index: 7, kind: output, shape index: {}]  }
   0x1   :  { %13 = vsyncpa [#allocation6], 0 }
   0x2   :  { %14 = vsyncpa [#allocation9], 0 }
   0x3   :  { %15 = vsyncpa [#allocation4], 0  ;;  %s688_s24 = smov [#allocation5]   ;;  %s570_s28 = scalar_lea.hbm %s838_s1, 512 }
   0x4   :  { %s31_s25 = sshll.u32 %s688_s24, 4  ;;  %p571_p0 = scmp.ne.s32.totalorder %s838_s1, %s570_s28  ;;  %s32_s25 = int_to_ptr.vmem [resolvable:$true] %s31_s25 }
   0x5   :  { %p574_p1 = scmp.lt.u32.totalorder %s570_s28, %s838_s1 }
   0x7   :  { %p576_p2 = pnand %p574_p1, %p571_p0 }
   0x9   :  { %579 = shalt.err (!%p576_p2)
}
   0xa   :  { %s580_s10 = scalar_lea.vmem %s32_s25, 512  ;;  %p585_p4 = scmp.lt.s32.totalorder %s32_s25, %s32_s25 }
   0xb   :  { %p581_p3 = scmp.ne.s32.totalorder %s32_s25, %s580_s10  ;;  %p586_p5 = scmp.lt.s32.totalorder %s580_s10, %s580_s10 }
   0xd   :  { %p587_p6 = por %p586_p5, %p585_p4 }
   0xf   :  { %p588_p7 = pnand %p587_p6, %p581_p3 }
  0x11   :  { %591 = shalt.err (!%p588_p7)
}
  0x12   :  { %s689_s11 = smov 128   ;;  %s690_s12 = smov 8  }
  0x13   :  { %37 = dma.hbm_to_vmem [thread:$0]  %s838_s1, 512, %s32_s25, [#allocation6], %s689_s11, %s689_s11, %s690_s12  }
  0x14   :  { %s691_s15 = smov [#allocation2]   ;;  %s692_s17 = smov [#allocation7]  }
  0x15   :  { %s22_s16 = sshll.u32 %s691_s15, 4  ;;  %s45_s18 = sshll.u32 %s692_s17, 4  ;;  %s23_s16 = int_to_ptr.vmem [resolvable:$true] %s22_s16  ;;  %s46_s18 = int_to_ptr.vmem [resolvable:$true] %s45_s18 }
  0x16   :  { %s592_s21 = scalar_lea.hbm %s837_s0, 128 }
  0x17   :  { %p593_p8 = scmp.ne.s32.totalorder %s837_s0, %s592_s21  ;;  %p596_p9 = scmp.lt.u32.totalorder %s592_s21, %s837_s0 }
  0x19   :  { %p598_p10 = pnand %p596_p9, %p593_p8 }
  0x1b   :  { %601 = shalt.err (!%p598_p10)
}
  0x1c   :  { %s602_s1 = scalar_lea.vmem %s23_s16, 128  ;;  %p607_p12 = scmp.lt.s32.totalorder %s23_s16, %s23_s16 }
  0x1d   :  { %p603_p11 = scmp.ne.s32.totalorder %s23_s16, %s602_s1  ;;  %p608_p13 = scmp.lt.s32.totalorder %s602_s1, %s602_s1 }
  0x1f   :  { %p609_p0 = por %p608_p13, %p607_p12 }
  0x21   :  { %p610_p1 = pnand %p609_p0, %p603_p11 }
  0x23   :  { %613 = shalt.err (!%p610_p1)
}
  0x24   :  { %25 = dma.hbm_to_vmem [thread:$0]  %s837_s0, 128, %s23_s16, [#allocation3]  }
  0x25   :  { %s614_s30 = scalar_lea.hbm %s840_s3, 2048 }
  0x26   :  { %p615_p2 = scmp.ne.s32.totalorder %s840_s3, %s614_s30  ;;  %p618_p3 = scmp.lt.u32.totalorder %s614_s30, %s840_s3 }
  0x28   :  { %p620_p4 = pnand %p618_p3, %p615_p2 }
  0x2a   :  { %623 = shalt.err (!%p620_p4)
}
  0x2b   :  { %s624_s14 = scalar_lea.vmem %s46_s18, 2048  ;;  %p629_p6 = scmp.lt.s32.totalorder %s46_s18, %s46_s18 }
  0x2c   :  { %p625_p5 = scmp.ne.s32.totalorder %s46_s18, %s624_s14  ;;  %p630_p7 = scmp.lt.s32.totalorder %s624_s14, %s624_s14 }
  0x2e   :  { %p631_p8 = por %p630_p7, %p629_p6 }
  0x30   :  { %p632_p9 = pnand %p631_p8, %p625_p5 }
  0x32   :  { %635 = shalt.err (!%p632_p9)
}
  0x33   :  { %51 = dma.hbm_to_vmem [thread:$0]  %s840_s3, 2048, %s46_s18, [#allocation6], %s689_s11, %s689_s11, %s690_s12  }
  0x34   :  { %s693_s16 = smov [#allocation8]   ;;  %s636_s21 = scalar_lea.hbm %s842_s5, 2048 }
  0x35   :  { %s59_s17 = sshll.u32 %s693_s16, 4  ;;  %p637_p10 = scmp.ne.s32.totalorder %s842_s5, %s636_s21  ;;  %s60_s17 = int_to_ptr.vmem [resolvable:$true] %s59_s17 }
  0x36   :  { %p640_p11 = scmp.lt.u32.totalorder %s636_s21, %s842_s5 }
  0x38   :  { %p642_p12 = pnand %p640_p11, %p637_p10 }
  0x3a   :  { %645 = shalt.err (!%p642_p12)
}
  0x3b   :  { %s646_s1 = scalar_lea.vmem %s60_s17, 2048  ;;  %p651_p0 = scmp.lt.s32.totalorder %s60_s17, %s60_s17 }
  0x3c   :  { %p647_p13 = scmp.ne.s32.totalorder %s60_s17, %s646_s1  ;;  %p652_p1 = scmp.lt.s32.totalorder %s646_s1, %s646_s1 }
  0x3e   :  { %p653_p2 = por %p652_p1, %p651_p0 }
  0x40   :  { %p654_p3 = pnand %p653_p2, %p647_p13 }
  0x42   :  { %657 = shalt.err (!%p654_p3)
}
  0x43   :  { %65 = dma.hbm_to_vmem [thread:$0]  %s842_s5, 2048, %s60_s17, [#allocation9], %s689_s11, %s689_s11, %s690_s12  }
  0x44   :  { %680 = dma.done.wait [#allocation3], 128  }
  0x45   :  { %681 = vsyncadd [#allocation3], 4294967168 }
  0x46   :  { %682 = dma.done.wait [#allocation6], 2560  }
  0x47   :  { %683 = vsyncadd [#allocation6], 4294964736 }
  0x48   :  { %684 = dma.done.wait [#allocation9], 2048  }
  0x49   :  { %685 = vsyncadd [#allocation9], 4294965248  ;;  %v694_v0 = vmov 0.0|0.0   ;;  %vm695_vm0 = vmmov 0   ;;  %v696_v1 = vmov 0.0   ;;  %v81_v2 = vld [vmem:[#allocation5] sm:$0xff] }
  0x4a   :  { %502 = vmatprep.subr.bf16.mxu0 %v694_v0  ;;  %429 = vmatprep.mubr.msk.f32.mxu0 %vm695_vm0, %v696_v1  ;;  %v82_v3 = vld [vmem:[#allocation5 + $0x8] sm:$0xff]  ;;  %v83_v4 = vld [vmem:[#allocation5 + $0x10] sm:$0xff]  ;;  %v84_v6 = vld [vmem:[#allocation5 + $0x18] sm:$0xff]  ;;  %vm92_vm1 = vcmask 261120   ;;  %s697_s28 = smov [#allocation10]  }
  0x4b   :  { %508 = vmatprep.subr.bf16.mxu1 %v694_v0  ;;  %464 = vmatprep.mubr.msk.f32.mxu1 %vm695_vm0, %v696_v1  ;;  %v503_v5 = vpack.c.bf16 %v82_v3, %v81_v2  ;;  %v167_v7 = vld [vmem:[#allocation7] sm:$0xff]  ;;  %v168_v8 = vld [vmem:[#allocation7 + $0x8] sm:$0xff]  ;;  %v169_v9 = vld [vmem:[#allocation7 + $0x10] sm:$0xff]  ;;  %v506_v11 = vpack.c.bf16 %v84_v6, %v83_v4 }
  0x4c   :  { %v170_v10 = vld [vmem:[#allocation7 + $0x18] sm:$0xff]  ;;  %v509_v12 = vpack.c.bf16 %v168_v8, %v167_v7  ;;  %v171_v14 = vld [vmem:[#allocation7 + $0x20] sm:$0xff]  ;;  %v172_v15 = vld [vmem:[#allocation7 + $0x28] sm:$0xff] }
  0x4d   :  { %504 = vmatpush3.bf16.msra.mxu0 %v503_v5  ;;  %v512_v13 = vpack.c.bf16 %v170_v10, %v169_v9  ;;  %v80_v16 = vld [vmem:[#allocation2] sm:$0xff]  ;;  %v515_v17 = vpack.c.bf16 %v172_v15, %v171_v14  ;;  %v173_v18 = vld [vmem:[#allocation7 + $0x30] sm:$0xff]  ;;  %v175_v21 = vld [vmem:[#allocation7 + $0x40] sm:$0xff] }
  0x4e   :  { %505 = vmatprep.subr.bf16.mxu0 %v694_v0  ;;  %510 = vmatpush3.bf16.msra.mxu1 %v509_v12  ;;  %v174_v19 = vld [vmem:[#allocation7 + $0x38] sm:$0xff]  ;;  %v176_v22 = vld [vmem:[#allocation7 + $0x48] sm:$0xff]  ;;  %v177_v24 = vld [vmem:[#allocation7 + $0x50] sm:$0xff] }
  0x4f   :  { %511 = vmatprep.subr.bf16.mxu1 %v694_v0  ;;  %v518_v20 = vpack.c.bf16 %v174_v19, %v173_v18  ;;  %v521_v23 = vpack.c.bf16 %v176_v22, %v175_v21  ;;  %v178_v25 = vld [vmem:[#allocation7 + $0x58] sm:$0xff]  ;;  %v179_v27 = vld [vmem:[#allocation7 + $0x60] sm:$0xff]  ;;  %v180_v28 = vld [vmem:[#allocation7 + $0x68] sm:$0xff] }
  0x50   :  { %v524_v26 = vpack.c.bf16 %v178_v25, %v177_v24  ;;  %v527_v29 = vpack.c.bf16 %v180_v28, %v179_v27  ;;  %v181_v30 = vld [vmem:[#allocation7 + $0x70] sm:$0xff]  ;;  %v182_v31 = vld [vmem:[#allocation7 + $0x78] sm:$0xff]  ;;  %v261_v33 = vld [vmem:[#allocation8] sm:$0xff] }
  0x51   :  { %507 = vmatpush3.bf16.msra.mxu0 %v506_v11  ;;  %v530_v32 = vpack.c.bf16 %v182_v31, %v181_v30  ;;  %v262_v34 = vld [vmem:[#allocation8 + $0x8] sm:$0xff]  ;;  %v263_v35 = vld [vmem:[#allocation8 + $0x10] sm:$0xff]  ;;  %v264_v37 = vld [vmem:[#allocation8 + $0x18] sm:$0xff] }
  0x52   :  { %532 = vmatprep.subr.bf16.mxu0 %v694_v0  ;;  %513 = vmatpush3.bf16.msra.mxu1 %v512_v13  ;;  %v533_v36 = vpack.c.bf16 %v262_v34, %v261_v33  ;;  %v536_v38 = vpack.c.bf16 %v264_v37, %v263_v35  ;;  %v265_v39 = vld [vmem:[#allocation8 + $0x20] sm:$0xff]  ;;  %v266_v40 = vld [vmem:[#allocation8 + $0x28] sm:$0xff]  ;;  %v267_v42 = vld [vmem:[#allocation8 + $0x30] sm:$0xff] }
  0x53   :  { %514 = vmatprep.subr.bf16.mxu1 %v694_v0  ;;  %v539_v41 = vpack.c.bf16 %v266_v40, %v265_v39  ;;  %v268_v43 = vld [vmem:[#allocation8 + $0x38] sm:$0xff]  ;;  %v269_v45 = vld [vmem:[#allocation8 + $0x40] sm:$0xff]  ;;  %v270_v46 = vld [vmem:[#allocation8 + $0x48] sm:$0xff] }
  0x54   :  { %430 = vmatmul.mubr.msk.f32.vlgmr.msra.gmra.mrb[0].mxu0 %vm92_vm1, %v80_v16  ;;  %v542_v44 = vpack.c.bf16 %v268_v43, %v267_v42  ;;  %v545_v47 = vpack.c.bf16 %v270_v46, %v269_v45  ;;  %v271_v48 = vld [vmem:[#allocation8 + $0x50] sm:$0xff]  ;;  %v272_v49 = vld [vmem:[#allocation8 + $0x58] sm:$0xff]  ;;  %v273_v51 = vld [vmem:[#allocation8 + $0x60] sm:$0xff] }
  0x55   :  { %499 = vmatprep.mubr.msk.f32.mxu0 %vm695_vm0, %v696_v1  ;;  %534 = vmatpush3.bf16.msra.mxu0 %v533_v36  ;;  %v548_v50 = vpack.c.bf16 %v272_v49, %v271_v48  ;;  %v274_v52 = vld [vmem:[#allocation8 + $0x68] sm:$0xff]  ;;  %v378_v54 = vld [vmem:[%s839_s2] ss:$0 sm:$0xff]  ;;  %v275_v59 = vld [vmem:[#allocation8 + $0x70] sm:$0xff] }
  0x56   :  { %516 = vmatpush3.bf16.msra.mxu1 %v515_v17  ;;  %535 = vmatprep.subr.bf16.mxu0 %v694_v0  ;;  %v551_v53 = vpack.c.bf16 %v274_v52, %v273_v51  ;;  %v276_v60 = vld [vmem:[#allocation8 + $0x78] sm:$0xff] }
  0x57   :  { %517 = vmatprep.subr.bf16.mxu1 %v694_v0  ;;  %v554_v61 = vpack.c.bf16 %v276_v60, %v275_v59  ;;  %v380_v62 = vld [vmem:[%s841_s4] ss:$0 sm:$0xff]  ;;  %s367_s4 = sshll.u32 %s697_s28, 4  ;;  %s368_s4 = int_to_ptr.vmem [resolvable:$true] %s367_s4 }
  0x58   :  { %v381_v3 = vld [vmem:[%s843_s6] ss:$0 sm:$0xff]  ;;  %s658_s29 = scalar_lea.vmem %s368_s4, 128  ;;  %p663_p5 = scmp.lt.s32.totalorder %s368_s4, %s368_s4 }
  0x59   :  { %537 = vmatpush3.bf16.msra.mxu0 %v536_v38  ;;  %p659_p4 = scmp.ne.s32.totalorder %s368_s4, %s658_s29  ;;  %p664_p6 = scmp.lt.s32.totalorder %s658_s29, %s658_s29 }
  0x5a   :  { %519 = vmatpush3.bf16.msra.mxu1 %v518_v20  ;;  %538 = vmatprep.subr.bf16.mxu0 %v694_v0 }
  0x5b   :  { %520 = vmatprep.subr.bf16.mxu1 %v694_v0  ;;  %p665_p7 = por %p664_p6, %p663_p5 }
  0x5d   :  { %540 = vmatpush3.bf16.msra.mxu0 %v539_v41  ;;  %p666_p8 = pnand %p665_p7, %p659_p4 }
  0x5e   :  { %522 = vmatpush3.bf16.msra.mxu1 %v521_v23  ;;  %541 = vmatprep.subr.bf16.mxu0 %v694_v0 }
  0x5f   :  { %523 = vmatprep.subr.bf16.mxu1 %v694_v0 }
  0x61   :  { %543 = vmatpush3.bf16.msra.mxu0 %v542_v44 }
  0x62   :  { %525 = vmatpush3.bf16.msra.mxu1 %v524_v26  ;;  %544 = vmatprep.subr.bf16.mxu0 %v694_v0 }
  0x63   :  { %526 = vmatprep.subr.bf16.mxu1 %v694_v0 }
  0x65   :  { %546 = vmatpush3.bf16.msra.mxu0 %v545_v47 }
  0x66   :  { %528 = vmatpush3.bf16.msra.mxu1 %v527_v29  ;;  %547 = vmatprep.subr.bf16.mxu0 %v694_v0 }
  0x67   :  { %529 = vmatprep.subr.bf16.mxu1 %v694_v0 }
  0x69   :  { %549 = vmatpush3.bf16.msra.mxu0 %v548_v50 }
  0x6a   :  { %531 = vmatpush3.bf16.msra.mxu1 %v530_v32  ;;  %550 = vmatprep.subr.bf16.mxu0 %v694_v0 }
  0x6d   :  { %552 = vmatpush3.bf16.msra.mxu0 %v551_v53 }
  0x6e   :  { %553 = vmatprep.subr.bf16.mxu0 %v694_v0 }
  0x71   :  { %555 = vmatpush3.bf16.msra.mxu0 %v554_v61 }
 0x127   :  { %v162_v55 = vpop.f32.mrb[0].mxu0 }
 0x128   :  { %v163_v56 = vadd.f32 %v378_v54, %v162_v55  ;;  %v431_v57 = vpop.f32.mrb[1].mxu0 }
 0x12a   :  { %v166_v58 = vmax.f32 %v163_v56, 0.0 }
 0x12c   :  { %465 = vmatmul.mubr.f32.vlgmr.msra.gmra.mrb[0].mxu1 %v166_v58 }
 0x1ff   :  { %v256_v63 = vpop.f32.mrb[0].mxu1 }
 0x200   :  { %v257_v1 = vadd.f32 %v380_v62, %v256_v63  ;;  %v466_v0 = vpop.f32.mrb[1].mxu1 }
 0x202   :  { %v260_v2 = vmax.f32 %v257_v1, 0.0 }
 0x204   :  { %500 = vmatmul.mubr.f32.vlgmr.msra.gmra.mrb[2].mxu0 %v260_v2 }
 0x2d7   :  { %v350_v4 = vpop.f32.mrb[2].mxu0 }
 0x2d8   :  { %v351_v5 = vadd.f32 %v381_v3, %v350_v4  ;;  %v501_v6 = vpop.f32.mrb[3].mxu0 }
 0x2da   :  { %v354_v7 = vsub.f32 0.0, %v351_v5 }
 0x2dc   :  { %v355_v8 = vmul.f32 1.442695, %v354_v7 }
 0x2de   :  { %566 = vpow2.f32 %v355_v8 }
 0x2e8   :  { %v567_v9 = vpop.eup %566 }
 0x2e9   :  { %v357_v10 = vadd.f32 1.0, %v567_v9 }
 0x2eb   :  { %568 = vrcp.f32 %v357_v10 }
 0x2f5   :  { %v569_v11 = vpop.eup %568 }
 0x2f6   :  { %360 = vst [vmem:[#allocation10] sm:$0xff] %v569_v11 }
 0x2f7   :  { %669 = shalt.err (!%p666_p8)
}
 0x2f8   :  { %s670_s8 = scalar_lea.hbm %s844_s7, 128 }
 0x2f9   :  { %p671_p9 = scmp.ne.s32.totalorder %s844_s7, %s670_s8  ;;  %p674_p10 = scmp.lt.u32.totalorder %s670_s8, %s844_s7 }
 0x2fb   :  { %p676_p11 = pnand %p674_p10, %p671_p9 }
 0x2fd   :  { %679 = shalt.err (!%p676_p11)
}
 0x2fe   :  { %370 = dma.vmem_to_hbm [thread:$0]  %s368_s4, 128, %s844_s7, [#allocation4]  }
 0x2ff   :  { %686 = dma.done.wait [#allocation4], 128  }
 0x300   :  { %687 = vsyncadd [#allocation4], 4294967168 }
 0x301   :  { %374 = vsyncpa [#allocation3], 1 }
 0x302   :  { %375 = vsyncpa [#allocation6], 1 }
 0x303   :  { %376 = vsyncpa [#allocation9], 1 }
 0x304   :  { %377 = vsyncpa [#allocation4], 1 }

</bundles_post_ra>
